<compile_context>
chip_gen: v6e
topology: v6e:2x2x1
jax: 0.10.0
libtpu: 0.0.40
codegen_flags: <defaults>
</compile_context>

<pallas_src>
import jax
import jax.numpy as jnp
from jax.experimental import pallas as pl
from jax.experimental.pallas import tpu as pltpu

NEG_SLOPE = 0.01  # torch.nn.LeakyReLU default


def _round_up(a: int, b: int) -> int:
    return (a + b - 1) // b * b


def _cdiv(a: int, b: int) -> int:
    return (a + b - 1) // b


def _balanced_tile(dim: int, cap: int, align: int) -> int:
    """Pick a tile <= ~cap that splits `dim` nearly evenly (padding <= one align unit)."""
    if dim <= cap:
        return dim
    nsplit = _cdiv(dim, cap)
    return min(_round_up(_cdiv(dim, nsplit), align), dim)


# ----------------------------- kernels --------------------------------------


def _fc_leaky_relu_single_kernel(x_ref, w_ref, o_ref):
    # Whole (padded) problem in one step: dot straight to output, fused LeakyReLU.
    acc = jnp.dot(x_ref[...], w_ref[...], preferred_element_type=jnp.float32)
    # LeakyReLU: for acc < 0, slope*acc > acc, so max() selects slope*acc.
    o_ref[...] = jnp.maximum(acc, NEG_SLOPE * acc).astype(o_ref.dtype)


def _fc_leaky_relu_kernel_f32out(x_ref, w_ref, o_ref):
    # f32 output: accumulate directly into the resident output block (no scratch).
    @pl.when(pl.program_id(2) == 0)
    def _init():
        o_ref[...] = jnp.zeros_like(o_ref)

    o_ref[...] += jnp.dot(x_ref[...], w_ref[...], preferred_element_type=jnp.float32)

    @pl.when(pl.program_id(2) == pl.num_programs(2) - 1)
    def _finalize():
        acc = o_ref[...]
        o_ref[...] = jnp.maximum(acc, NEG_SLOPE * acc)


def _fc_leaky_relu_kernel_acc(x_ref, w_ref, o_ref, acc_ref):
    # Sub-f32 output: f32 VMEM accumulator, cast on finalize.
    @pl.when(pl.program_id(2) == 0)
    def _init():
        acc_ref[...] = jnp.zeros_like(acc_ref)

    acc_ref[...] += jnp.dot(x_ref[...], w_ref[...], preferred_element_type=jnp.float32)

    @pl.when(pl.program_id(2) == pl.num_programs(2) - 1)
    def _finalize():
        acc = acc_ref[...]
        o_ref[...] = jnp.maximum(acc, NEG_SLOPE * acc).astype(o_ref.dtype)


# ----------------------------- wrapper ---------------------------------------


def fc_leaky_relu(data, weight, *, tm_cap: int = 512, tn_cap: int = 512,
                  tk_cap: int = 1024, cast_inputs_to_bf16: bool = False):
    """data: (N, ...) any trailing shape; weight: (in_features, out_features).

    Returns (N, out_features) = LeakyReLU(flatten(data) @ weight).
    Set cast_inputs_to_bf16=True to trade a little accuracy for much higher MXU
    throughput on v6e/v7x with f32 inputs.
    """
    n = data.shape[0]
    x = data.reshape(n, -1)                      # Flatten(start_dim=1)
    in_f, out_f = weight.shape
    assert x.shape[1] == in_f, (x.shape, weight.shape)

    out_dtype = x.dtype
    mm_dtype = (jnp.bfloat16 if (cast_inputs_to_bf16 and x.dtype == jnp.float32)
                else x.dtype)
    x_item = jnp.dtype(mm_dtype).itemsize
    o_item = jnp.dtype(out_dtype).itemsize
    # Native sublane packing: f32 -> 8, bf16 -> 16, int8/fp8 -> 32.
    sublane = max(8, 32 // x_item)

    # ---- lane-dense padding targets ----
    m_pad = _round_up(n, sublane)
    k_pad = _round_up(in_f, 128)
    n_pad = _round_up(out_f, 128)

    # ---- balanced tiles (padding waste bounded by one alignment unit) ----
    tm = _balanced_tile(m_pad, tm_cap, sublane)
    tk = _balanced_tile(k_pad, tk_cap, 128)
    tn = _balanced_tile(n_pad, tn_cap, 128)

    mp = _round_up(m_pad, tm)
    kp = _round_up(k_pad, tk)
    np_ = _round_up(n_pad, tn)

    def _maybe_pad(a, shape):
        if a.shape == shape:
            return a
        return jnp.pad(a, [(0, t - s) for s, t in zip(a.shape, shape)])

    # TODO(synk): in a real module, hoist the weight pad/cast to __init__ so the
    # (kp, np_) weight layout is built once, not on every forward call.
    x_p = _maybe_pad(x, (mp, kp)).astype(mm_dtype)
    w_p = _maybe_pad(weight, (kp, np_)).astype(mm_dtype)

    cost = pl.CostEstimate(
        flops=2 * mp * np_ * kp,
        transcendentals=0,
        bytes_accessed=(mp * kp + kp * np_) * x_item + mp * np_ * o_item,
    )

    # ---- fast path: whole padded problem fits in VMEM -> single-step kernel ----
    single_bytes = (mp * kp + kp * np_) * x_item + mp * np_ * (4 + o_item)
    if single_bytes <= (8 << 20):
        out_padded = pl.pallas_call(
            _fc_leaky_relu_single_kernel,
            out_shape=jax.ShapeDtypeStruct((mp, np_), out_dtype),
            grid_spec=pltpu.PrefetchScalarGridSpec(
                num_scalar_prefetch=0,
                grid=(1,),
                in_specs=[
                    pl.BlockSpec((mp, kp), lambda i: (0, 0)),
                    pl.BlockSpec((kp, np_), lambda i: (0, 0)),
                ],
                out_specs=pl.BlockSpec((mp, np_), lambda i: (0, 0)),
            ),
            compiler_params=pltpu.CompilerParams(
                dimension_semantics=("arbitrary",),
                vmem_limit_bytes=max(2 * single_bytes, 16 << 20),
            ),
            cost_estimate=cost,
        )(x_p, w_p)
        return out_padded[:n, :out_f]

    # ---- tiled path ----
    # v7x megacore: make sure at least one 'parallel' axis has >= 2 blocks.
    if mp // tm == 1 and np_ // tn == 1 and tn % 256 == 0:
        tn //= 2

    grid = (mp // tm, np_ // tn, kp // tk)

    use_acc_scratch = out_dtype != jnp.float32
    kernel = _fc_leaky_relu_kernel_acc if use_acc_scratch else _fc_leaky_relu_kernel_f32out
    scratch = [pltpu.VMEM((tm, tn), jnp.float32)] if use_acc_scratch else []

    # Double-buffered inputs + (optional) acc scratch + double-buffered output.
    budget = (2 * (tm * tk + tk * tn) * x_item
              + (tm * tn * 4 if use_acc_scratch else 0)
              + 2 * tm * tn * o_item)
    vmem_limit = min(max(budget + (8 << 20), 24 << 20), 48 << 20)

    out_padded = pl.pallas_call(
        kernel,
        out_shape=jax.ShapeDtypeStruct((mp, np_), out_dtype),
        grid_spec=pltpu.PrefetchScalarGridSpec(
            num_scalar_prefetch=0,
            grid=grid,
            in_specs=[
                pl.BlockSpec((tm, tk), lambda i, j, k: (i, k)),
                pl.BlockSpec((tk, tn), lambda i, j, k: (k, j)),
            ],
            out_specs=pl.BlockSpec((tm, tn), lambda i, j, k: (i, j)),
            scratch_shapes=scratch,
        ),
        compiler_params=pltpu.CompilerParams(
            dimension_semantics=("parallel", "parallel", "arbitrary"),
            vmem_limit_bytes=vmem_limit,
        ),
        cost_estimate=cost,
    )(x_p, w_p)

    # Slice away the padding (lane-dense write happened on the padded slab).
    return out_padded[:n, :out_f]


def reference(data, weight):
    x = data.reshape(data.shape[0], -1).astype(jnp.float32)
    y = x @ weight.astype(jnp.float32)
    return jnp.where(y >= 0.0, y, NEG_SLOPE * y)


if __name__ == "__main__":
    key = jax.random.PRNGKey(0)
    k_data, k_w = jax.random.split(key)

    # data flattens to in_features = 2*4*4 = 32; out_features = 16.
    batch, c, h, w = 8, 2, 4, 4
    in_channels = c * h * w
    out_channels = 16

    data = jax.random.normal(k_data, (batch, c, h, w), dtype=jnp.float32)
    # Deterministic weight init, stored as (in, out) == torch W.T.
    bound = 1.0 / (in_channels ** 0.5)
    weight = jax.random.uniform(
        k_w, (in_channels, out_channels), dtype=jnp.float32,
        minval=-bound, maxval=bound)

    out = fc_leaky_relu(data, weight)
    out = jax.block_until_ready(out)

    ref = reference(data, weight)
    assert out.shape == (batch, out_channels), out.shape
    assert jnp.allclose(out, ref, atol=1e-5, rtol=1e-5), "mismatch vs reference"

    print("KERNEL_OK")
</pallas_src>

<mosaic_0001>
module attributes {stable_mosaic.version = 11 : i64} {
  func.func @_fc_leaky_relu_single_kernel(%arg0: i32, %arg1: memref<8x128xf32, #tpu.memory_space<vmem>>, %arg2: memref<128x128xf32, #tpu.memory_space<vmem>>, %arg3: memref<8x128xf32, #tpu.memory_space<vmem>>) attributes {dimension_semantics = [#tpu.dimension_semantics<arbitrary>], iteration_bounds = array<i64: 1>, scalar_prefetch = 0 : i64, scratch_operands = 0 : i64, tpu.core_type = #tpu.core_type<tc>, window_params = [{pipeline_mode = #tpu.pipeline_mode<synchronous>, transform_indices = @transform_0, window_bounds = array<i64: 8, 128>}, {pipeline_mode = #tpu.pipeline_mode<synchronous>, transform_indices = @transform_1, window_bounds = array<i64: 128, 128>}, {pipeline_mode = #tpu.pipeline_mode<synchronous>, transform_indices = @transform_2, window_bounds = array<i64: 8, 128>}]} {
    %c0 = arith.constant 0 : index
    %c0_0 = arith.constant 0 : index
    %0 = vector.load %arg1[%c0, %c0_0] : memref<8x128xf32, #tpu.memory_space<vmem>>, vector<8x128xf32>
    %c0_1 = arith.constant 0 : index
    %c0_2 = arith.constant 0 : index
    %1 = vector.load %arg2[%c0_1, %c0_2] : memref<128x128xf32, #tpu.memory_space<vmem>>, vector<128x128xf32>
    %cst = arith.constant dense<0.000000e+00> : vector<8x128xf32>
    %2 = tpu.matmul %0, %1, %cst {dimension_numbers = #tpu.dot_dimension_numbers<[1], [0], [0], [1], [0, 0, 1, 1], [], []>} : vector<8x128xf32>, vector<128x128xf32>, vector<8x128xf32> -> vector<8x128xf32>
    %cst_3 = arith.constant 0.00999999977 : f32
    %3 = vector.broadcast %cst_3 : f32 to vector<8x128xf32>
    %4 = arith.mulf %3, %2 : vector<8x128xf32>
    %5 = arith.maximumf %2, %4 : vector<8x128xf32>
    %c0_4 = arith.constant 0 : index
    %c0_5 = arith.constant 0 : index
    %6 = vector.load %arg3[%c0_4, %c0_5] : memref<8x128xf32, #tpu.memory_space<vmem>>, vector<8x128xf32>
    tpu.vector_store %arg3[%c0_4, %c0_5], %5 {strides = array<i32>} : memref<8x128xf32, #tpu.memory_space<vmem>>, vector<8x128xf32>,
    return
  }
  func.func @transform_0(%arg0: i32) -> (i32, i32) {
    %c0_i32 = arith.constant 0 : i32
    %c0_i32_0 = arith.constant 0 : i32
    %c0_i32_1 = arith.constant 0 : i32
    return %c0_i32, %c0_i32_0 : i32, i32
  }
  func.func @transform_1(%arg0: i32) -> (i32, i32) {
    %c0_i32 = arith.constant 0 : i32
    %c0_i32_0 = arith.constant 0 : i32
    %c0_i32_1 = arith.constant 0 : i32
    return %c0_i32, %c0_i32_0 : i32, i32
  }
  func.func @transform_2(%arg0: i32) -> (i32, i32) {
    %c0_i32 = arith.constant 0 : i32
    %c0_i32_0 = arith.constant 0 : i32
    %c0_i32_1 = arith.constant 0 : i32
    return %c0_i32, %c0_i32_0 : i32, i32
  }
}

</mosaic_0001>

<bundles_post_ra>
// kernel: tpu_custom_call.1
= control target key start
LH: loop header
LB: loop body
LE: loop exit
PB: predicated region body
PF: predicated region fallthrough
CT: control target
= control target key end

     0   :  { %7 = vsyncpa [#allocation3], 0  ;;  %s300_s0 = inlined_call_operand.hbm [shape: f32[8,128], index: 0, kind: input, shape index: {}]   ;;  %s301_s1 = inlined_call_operand.hbm [shape: f32[128,128], index: 1, kind: input, shape index: {}]   ;;  %s302_s2 = inlined_call_operand.hbm [shape: f32[8,128], index: 2, kind: output, shape index: {}]  }
   0x1   :  { %8 = vsyncpa [#allocation6], 0 }
   0x2   :  { %9 = vsyncpa [#allocation4], 0  ;;  %s269_s9 = smov [#allocation2]   ;;  %s270_s11 = smov [#allocation5]  }
   0x3   :  { %s16_s10 = sshll.u32 %s269_s9, 4  ;;  %s25_s12 = sshll.u32 %s270_s11, 4  ;;  %s17_s10 = int_to_ptr.vmem [resolvable:$true] %s16_s10  ;;  %s26_s12 = int_to_ptr.vmem [resolvable:$true] %s25_s12 }
   0x4   :  { %s211_s13 = scalar_lea.vmem %s17_s10, 128  ;;  %p216_p1 = scmp.lt.s32.totalorder %s17_s10, %s17_s10 }
   0x5   :  { %p212_p0 = scmp.ne.s32.totalorder %s17_s10, %s211_s13  ;;  %p217_p2 = scmp.lt.s32.totalorder %s211_s13, %s211_s13 }
   0x7   :  { %p218_p3 = por %p217_p2, %p216_p1 }
   0x9   :  { %p219_p4 = pnand %p218_p3, %p212_p0 }
   0xb   :  { %222 = shalt.err (!%p219_p4)
}
   0xc   :  { %19 = dma.hbm_to_vmem [thread:$0]  %s300_s0, 128, %s17_s10, [#allocation3]  }
   0xd   :  { %s231_s16 = scalar_lea.vmem %s26_s12, 2048  ;;  %p236_p6 = scmp.lt.s32.totalorder %s26_s12, %s26_s12 }
   0xe   :  { %p232_p5 = scmp.ne.s32.totalorder %s26_s12, %s231_s16  ;;  %p237_p7 = scmp.lt.s32.totalorder %s231_s16, %s231_s16 }
  0x10   :  { %p238_p8 = por %p237_p7, %p236_p6 }
  0x12   :  { %p239_p9 = pnand %p238_p8, %p232_p5 }
  0x14   :  { %242 = shalt.err (!%p239_p9)
}
  0x15   :  { %s271_s17 = smov 128   ;;  %s272_s18 = smov 8  }
  0x16   :  { %31 = dma.hbm_to_vmem [thread:$0]  %s301_s1, 2048, %s26_s12, [#allocation6], %s271_s17, %s271_s17, %s272_s18  }
  0x17   :  { %263 = dma.done.wait [#allocation3], 128  }
  0x18   :  { %264 = vsyncadd [#allocation3], 4294967168 }
  0x19   :  { %265 = dma.done.wait [#allocation6], 2048  }
  0x1a   :  { %266 = vsyncadd [#allocation6], 4294965248  ;;  %v273_v0 = vmov 0.0   ;;  %vm274_vm0 = vmmov 0   ;;  %v54_v1 = vld [vmem:[#allocation5 + $0x78] sm:$0xff]  ;;  %v53_v2 = vld [vmem:[#allocation5 + $0x70] sm:$0xff] }
  0x1b   :  { %161 = vmatprep.subr.mxu0 %v273_v0  ;;  %193 = vmatprep.mubr.msk.f32.mxu0 %vm274_vm0, %v273_v0  ;;  %v52_v3 = vld [vmem:[#allocation5 + $0x68] sm:$0xff]  ;;  %v51_v4 = vld [vmem:[#allocation5 + $0x60] sm:$0xff]  ;;  %v50_v5 = vld [vmem:[#allocation5 + $0x58] sm:$0xff]  ;;  %s275_s0 = smov [#allocation7]  }
  0x1c   :  { %162 = vmatpush3.msra.mxu0 %v54_v1  ;;  %v49_v6 = vld [vmem:[#allocation5 + $0x50] sm:$0xff]  ;;  %v48_v7 = vld [vmem:[#allocation5 + $0x48] sm:$0xff]  ;;  %v47_v8 = vld [vmem:[#allocation5 + $0x40] sm:$0xff]  ;;  %s134_s1 = sshll.u32 %s275_s0, 4  ;;  %s135_s1 = int_to_ptr.vmem [resolvable:$true] %s134_s1 }
  0x1d   :  { %163 = vmatprep.subr.mxu0 %v273_v0  ;;  %v46_v9 = vld [vmem:[#allocation5 + $0x38] sm:$0xff]  ;;  %v45_v10 = vld [vmem:[#allocation5 + $0x30] sm:$0xff]  ;;  %v44_v11 = vld [vmem:[#allocation5 + $0x28] sm:$0xff]  ;;  %s243_s21 = scalar_lea.vmem %s135_s1, 128  ;;  %p248_p11 = scmp.lt.s32.totalorder %s135_s1, %s135_s1 }
  0x1e   :  { %164 = vmatpush3.msra.mxu0 %v53_v2  ;;  %v43_v12 = vld [vmem:[#allocation5 + $0x20] sm:$0xff]  ;;  %v42_v13 = vld [vmem:[#allocation5 + $0x18] sm:$0xff]  ;;  %v41_v14 = vld [vmem:[#allocation5 + $0x10] sm:$0xff]  ;;  %p244_p10 = scmp.ne.s32.totalorder %s135_s1, %s243_s21  ;;  %p249_p12 = scmp.lt.s32.totalorder %s243_s21, %s243_s21 }
  0x1f   :  { %165 = vmatprep.subr.mxu0 %v273_v0  ;;  %v40_v15 = vld [vmem:[#allocation5 + $0x8] sm:$0xff]  ;;  %v39_v16 = vld [vmem:[#allocation5] sm:$0xff]  ;;  %v38_v17 = vld [vmem:[#allocation2] sm:$0xff] }
  0x20   :  { %166 = vmatpush3.msra.mxu0 %v52_v3  ;;  %p250_p13 = por %p249_p12, %p248_p11 }
  0x21   :  { %167 = vmatprep.subr.mxu0 %v273_v0 }
  0x22   :  { %168 = vmatpush3.msra.mxu0 %v51_v4  ;;  %p251_p0 = pnand %p250_p13, %p244_p10 }
  0x23   :  { %169 = vmatprep.subr.mxu0 %v273_v0 }
  0x24   :  { %170 = vmatpush3.msra.mxu0 %v50_v5 }
  0x25   :  { %171 = vmatprep.subr.mxu0 %v273_v0 }
  0x26   :  { %172 = vmatpush3.msra.mxu0 %v49_v6 }
  0x27   :  { %173 = vmatprep.subr.mxu0 %v273_v0 }
  0x28   :  { %174 = vmatpush3.msra.mxu0 %v48_v7 }
  0x29   :  { %175 = vmatprep.subr.mxu0 %v273_v0 }
  0x2a   :  { %176 = vmatpush3.msra.mxu0 %v47_v8 }
  0x2b   :  { %177 = vmatprep.subr.mxu0 %v273_v0 }
  0x2c   :  { %178 = vmatpush3.msra.mxu0 %v46_v9 }
  0x2d   :  { %179 = vmatprep.subr.mxu0 %v273_v0 }
  0x2e   :  { %180 = vmatpush3.msra.mxu0 %v45_v10 }
  0x2f   :  { %181 = vmatprep.subr.mxu0 %v273_v0 }
  0x30   :  { %182 = vmatpush3.msra.mxu0 %v44_v11 }
  0x31   :  { %183 = vmatprep.subr.mxu0 %v273_v0 }
  0x32   :  { %184 = vmatpush3.msra.mxu0 %v43_v12 }
  0x33   :  { %185 = vmatprep.subr.mxu0 %v273_v0 }
  0x34   :  { %186 = vmatpush3.msra.mxu0 %v42_v13 }
  0x35   :  { %187 = vmatprep.subr.mxu0 %v273_v0 }
  0x36   :  { %188 = vmatpush3.msra.mxu0 %v41_v14 }
  0x37   :  { %189 = vmatprep.subr.mxu0 %v273_v0 }
  0x38   :  { %190 = vmatpush3.msra.mxu0 %v40_v15 }
  0x39   :  { %191 = vmatprep.subr.mxu0 %v273_v0 }
  0x3a   :  { %192 = vmatpush3.msra.mxu0 %v39_v16 }
  0x3b   :  { %194 = vmatmul.mubr.f32.vlgmr.msra.gmra.mxu0 %v38_v17 }
  0xfb   :  { %v121_v18 = vpop.f32.mrf.mxu0 }
  0xfc   :  { %v125_v19 = vmul.f32 0.01, %v121_v18 }
  0xfd   :  { %v195_v20 = vpop.f32.mrf.mxu0 }
  0xfe   :  { %v126_v21 = vmax.f32 %v121_v18, %v125_v19 }
 0x100   :  { %127 = vst [vmem:[#allocation7] sm:$0xff] %v126_v21 }
 0x101   :  { %254 = shalt.err (!%p251_p0)
}
 0x102   :  { %137 = dma.vmem_to_hbm [thread:$0]  %s135_s1, 128, %s302_s2, [#allocation4]  }
 0x103   :  { %267 = dma.done.wait [#allocation4], 128  }
 0x104   :  { %268 = vsyncadd [#allocation4], 4294967168 }
 0x105   :  { %141 = vsyncpa [#allocation3], 1 }
 0x106   :  { %142 = vsyncpa [#allocation6], 1 }
 0x107   :  { %143 = vsyncpa [#allocation4], 1 }

</bundles_post_ra>
